<compile_context>
chip_gen: v5e
topology: v5e:2x2
jax: 0.10.0
libtpu: 0.0.40
codegen_flags: <defaults>
</compile_context>

<pallas_src>
import jax
import jax.numpy as jnp
from jax.experimental import pallas as pl
from jax.experimental.pallas import tpu as pltpu


def _round_up(n, m):
    return ((n + m - 1) // m) * m


def _choose_tile_b(B, tile_b):
    """Pick the batch tile: large for streaming, >=2 grid steps when possible."""
    if B <= 16:
        return B                        # single block == full (tiny) batch
    half = _round_up((B + 1) // 2, 8)   # split into ~2 tiles for v7x's 2 TCs
    return min(_round_up(tile_b, 8), half)


def _discriminator_kernel(x_ref, w1_ref, b1_ref, w2_ref, b2_ref, w3_ref, b3_ref,
                          o_ref):
    # Cast the streamed tile to bf16 in-kernel (no wrapper-side astype copy).
    x = x_ref[...].astype(jnp.bfloat16)                              # (TB, D)

    # fc1 + LeakyReLU(0.2)  -- bf16 MXU, f32 accumulate, f32 activation math
    h1 = jnp.dot(x, w1_ref[...], preferred_element_type=jnp.float32)
    h1 = h1 + b1_ref[...]
    h1 = jnp.maximum(h1, 0.2 * h1)

    # fc2 + LeakyReLU(0.2)
    h2 = jnp.dot(h1.astype(jnp.bfloat16), w2_ref[...],
                 preferred_element_type=jnp.float32)
    h2 = h2 + b2_ref[...]
    h2 = jnp.maximum(h2, 0.2 * h2)                                   # (TB, 64)

    # fc3 (out_features = 1): put the batch in the lane dimension (XLU
    # transpose), then VPU multiply + cross-sublane reduce.  Produces a
    # lane-dense (1, TB) row -> unmasked, contiguous output store.
    h2t = h2.T                                                       # (64, TB)
    logits = jnp.sum(h2t * w3_ref[...], axis=0, keepdims=True) + b3_ref[...]
    o_ref[...] = logits.astype(o_ref.dtype)                          # (1, TB)


def discriminator_forward(x, params, *, tile_b=2048):
    """x: (B, input_dim) float32 (or bfloat16).  params: dict of w1,b1,w2,b2,w3,b3."""
    B, D = x.shape

    # MXU weights in bf16 (tiny, cast once here); biases / fc3 weight stay f32
    # since they live on the VPU path.
    w1 = params["w1"].astype(jnp.bfloat16)                    # (D, 128)
    w2 = params["w2"].astype(jnp.bfloat16)                    # (128, 64)
    b1 = params["b1"].reshape(1, 128).astype(jnp.float32)     # (1, 128)
    b2 = params["b2"].reshape(1, 64).astype(jnp.float32)      # (1, 64)
    w3 = params["w3"].reshape(64, 1).astype(jnp.float32)      # (64, 1)
    b3 = params["b3"].reshape(1, 1).astype(jnp.float32)       # (1, 1)

    tb = _choose_tile_b(B, tile_b)
    num_tiles = -(-B // tb)    # cdiv; trailing ragged x block handled by Pallas

    # Advisory cost estimate (lane-padded x stream, dense output slab).
    flops = 2 * num_tiles * tb * (D * 128 + 128 * 64 + 64)
    bytes_accessed = (num_tiles * tb * 128 * x.dtype.itemsize   # x (lane-padded)
                      + num_tiles * tb * 4                      # dense f32 output
                      + (D * 128 + 128 * 64) * 2                # bf16 weights
                      + (128 + 64 + 64 + 1) * 4)                # f32 biases + w3

    out = pl.pallas_call(
        _discriminator_kernel,
        out_shape=jax.ShapeDtypeStruct((num_tiles, tb), jnp.float32),
        grid=(num_tiles,),
        in_specs=[
            pl.BlockSpec((tb, D), lambda i: (i, 0)),          # streamed x tiles
            pl.BlockSpec(w1.shape, lambda i: (0, 0)),         # VMEM-resident weights
            pl.BlockSpec(b1.shape, lambda i: (0, 0)),
            pl.BlockSpec(w2.shape, lambda i: (0, 0)),
            pl.BlockSpec(b2.shape, lambda i: (0, 0)),
            pl.BlockSpec(w3.shape, lambda i: (0, 0)),
            pl.BlockSpec(b3.shape, lambda i: (0, 0)),
        ],
        out_specs=pl.BlockSpec((1, tb), lambda i: (i, 0)),    # lane-dense row/tile
        compiler_params=pltpu.CompilerParams(
            dimension_semantics=("parallel",),
        ),
        cost_estimate=pl.CostEstimate(
            flops=flops, transcendentals=0, bytes_accessed=bytes_accessed),
    )(x, w1, b1, w2, b2, w3, b3)

    # Flat row-major order of the slab == original batch order.
    return out.reshape(-1)[:B].reshape(B, 1)


def init_params(key, input_dim):
    """Deterministic init mimicking PyTorch's U(-1/sqrt(fan_in), 1/sqrt(fan_in))."""
    def linear(k, fan_in, fan_out):
        kw, kb = jax.random.split(k)
        bound = 1.0 / jnp.sqrt(fan_in)
        w = jax.random.uniform(kw, (fan_in, fan_out), jnp.float32, -bound, bound)
        b = jax.random.uniform(kb, (1, fan_out), jnp.float32, -bound, bound)
        return w, b

    k1, k2, k3 = jax.random.split(key, 3)
    w1, b1 = linear(k1, input_dim, 128)
    w2, b2 = linear(k2, 128, 64)
    w3, b3 = linear(k3, 64, 1)
    return {"w1": w1, "b1": b1, "w2": w2, "b2": b2, "w3": w3, "b3": b3}


def _reference_forward(x, p):
    """Pure-JAX reference matching the kernel's bf16-input / f32-accumulate math."""
    xb = x.astype(jnp.bfloat16)
    w1 = p["w1"].astype(jnp.bfloat16)
    w2 = p["w2"].astype(jnp.bfloat16)
    h1 = jnp.dot(xb, w1, preferred_element_type=jnp.float32) + p["b1"]
    h1 = jnp.maximum(h1, 0.2 * h1)
    h2 = jnp.dot(h1.astype(jnp.bfloat16), w2,
                 preferred_element_type=jnp.float32) + p["b2"]
    h2 = jnp.maximum(h2, 0.2 * h2)
    return jnp.dot(h2, p["w3"].reshape(64, 1)) + p["b3"].reshape(1, 1)


if __name__ == "__main__":
    key = jax.random.PRNGKey(0)
    k_x, k_p = jax.random.split(key)

    batch, input_dim = 8, 32
    x = jax.random.normal(k_x, (batch, input_dim), jnp.float32)
    params = init_params(k_p, input_dim)

    out = jax.block_until_ready(discriminator_forward(x, params))
    ref = _reference_forward(x, params)
    assert out.shape == (batch, 1), out.shape
    assert jnp.allclose(out, ref, atol=1e-2, rtol=1e-2), "mismatch vs JAX reference"

    # Non-tile-multiple batch -> multi-tile grid with a ragged trailing x block.
    x_big = jax.random.normal(k_x, (1000, input_dim), jnp.float32)
    out_big = jax.block_until_ready(discriminator_forward(x_big, params))
    ref_big = _reference_forward(x_big, params)
    assert out_big.shape == (1000, 1)
    assert jnp.allclose(out_big, ref_big, atol=1e-2, rtol=1e-2), "mismatch (big batch)"

    # Batch large enough to hit the full-size tile path (even split, no ragged block).
    x_huge = jax.random.normal(k_x, (4096, input_dim), jnp.float32)
    out_huge = jax.block_until_ready(discriminator_forward(x_huge, params))
    ref_huge = _reference_forward(x_huge, params)
    assert out_huge.shape == (4096, 1)
    assert jnp.allclose(out_huge, ref_huge, atol=1e-2, rtol=1e-2), "mismatch (huge batch)"

    print("KERNEL_OK")
</pallas_src>

<mosaic_0001>
module attributes {stable_mosaic.version = 11 : i64} {
  func.func @_discriminator_kernel(%arg0: i32, %arg1: memref<8x32xf32, #tpu.memory_space<vmem>>, %arg2: memref<32x128xbf16, #tpu.memory_space<vmem>>, %arg3: memref<1x128xf32, #tpu.memory_space<vmem>>, %arg4: memref<128x64xbf16, #tpu.memory_space<vmem>>, %arg5: memref<1x64xf32, #tpu.memory_space<vmem>>, %arg6: memref<64x1xf32, #tpu.memory_space<vmem>>, %arg7: memref<1x1xf32, #tpu.memory_space<vmem>>, %arg8: memref<1x8xf32, #tpu.memory_space<vmem>>) attributes {dimension_semantics = [#tpu.dimension_semantics<parallel>], iteration_bounds = array<i64: 1>, scalar_prefetch = 0 : i64, scratch_operands = 0 : i64, tpu.core_type = #tpu.core_type<tc>, window_params = [{transform_indices = @transform_0, window_bounds = array<i64: 8, 32>}, {pipeline_mode = #tpu.pipeline_mode<synchronous>, transform_indices = @transform_1, window_bounds = array<i64: 32, 128>}, {pipeline_mode = #tpu.pipeline_mode<synchronous>, transform_indices = @transform_2, window_bounds = array<i64: 1, 128>}, {pipeline_mode = #tpu.pipeline_mode<synchronous>, transform_indices = @transform_3, window_bounds = array<i64: 128, 64>}, {pipeline_mode = #tpu.pipeline_mode<synchronous>, transform_indices = @transform_4, window_bounds = array<i64: 1, 64>}, {pipeline_mode = #tpu.pipeline_mode<synchronous>, transform_indices = @transform_5, window_bounds = array<i64: 64, 1>}, {pipeline_mode = #tpu.pipeline_mode<synchronous>, transform_indices = @transform_6, window_bounds = array<i64: 1, 1>}, {transform_indices = @transform_7, window_bounds = array<i64: 1, 8>}]} {
    %c0 = arith.constant 0 : index
    %c0_0 = arith.constant 0 : index
    %0 = vector.load %arg1[%c0, %c0_0] : memref<8x32xf32, #tpu.memory_space<vmem>>, vector<8x32xf32>
    %1 = arith.truncf %0 : vector<8x32xf32> to vector<8x32xbf16>
    %c0_1 = arith.constant 0 : index
    %c0_2 = arith.constant 0 : index
    %2 = vector.load %arg2[%c0_1, %c0_2] : memref<32x128xbf16, #tpu.memory_space<vmem>>, vector<32x128xbf16>
    %cst = arith.constant dense<0.000000e+00> : vector<8x128xf32>
    %3 = tpu.matmul %1, %2, %cst {dimension_numbers = #tpu.dot_dimension_numbers<[1], [0], [0], [1], [0, 0, 1, 1], [], []>} : vector<8x32xbf16>, vector<32x128xbf16>, vector<8x128xf32> -> vector<8x128xf32>
    %c0_3 = arith.constant 0 : index
    %c0_4 = arith.constant 0 : index
    %4 = vector.load %arg3[%c0_3, %c0_4] : memref<1x128xf32, #tpu.memory_space<vmem>>, vector<1x128xf32>
    %5 = vector.broadcast %4 : vector<1x128xf32> to vector<8x128xf32>
    %6 = arith.addf %3, %5 : vector<8x128xf32>
    %cst_5 = arith.constant 2.000000e-01 : f32
    %7 = vector.broadcast %cst_5 : f32 to vector<8x128xf32>
    %8 = arith.mulf %7, %6 : vector<8x128xf32>
    %9 = arith.maximumf %6, %8 : vector<8x128xf32>
    %10 = arith.truncf %9 : vector<8x128xf32> to vector<8x128xbf16>
    %c0_6 = arith.constant 0 : index
    %c0_7 = arith.constant 0 : index
    %11 = vector.load %arg4[%c0_6, %c0_7] : memref<128x64xbf16, #tpu.memory_space<vmem>>, vector<128x64xbf16>
    %cst_8 = arith.constant dense<0.000000e+00> : vector<8x64xf32>
    %12 = tpu.matmul %10, %11, %cst_8 {dimension_numbers = #tpu.dot_dimension_numbers<[1], [0], [0], [1], [0, 0, 1, 1], [], []>} : vector<8x128xbf16>, vector<128x64xbf16>, vector<8x64xf32> -> vector<8x64xf32>
    %c0_9 = arith.constant 0 : index
    %c0_10 = arith.constant 0 : index
    %13 = vector.load %arg5[%c0_9, %c0_10] : memref<1x64xf32, #tpu.memory_space<vmem>>, vector<1x64xf32>
    %14 = vector.broadcast %13 : vector<1x64xf32> to vector<8x64xf32>
    %15 = arith.addf %12, %14 : vector<8x64xf32>
    %cst_11 = arith.constant 2.000000e-01 : f32
    %16 = vector.broadcast %cst_11 : f32 to vector<8x64xf32>
    %17 = arith.mulf %16, %15 : vector<8x64xf32>
    %18 = arith.maximumf %15, %17 : vector<8x64xf32>
    %19 = tpu.transpose %18, [1, 0] : vector<8x64xf32> -> vector<64x8xf32>
    %c0_12 = arith.constant 0 : index
    %c0_13 = arith.constant 0 : index
    %20 = vector.load %arg6[%c0_12, %c0_13] : memref<64x1xf32, #tpu.memory_space<vmem>>, vector<64x1xf32>
    %21 = vector.broadcast %20 : vector<64x1xf32> to vector<64x8xf32>
    %22 = arith.mulf %19, %21 : vector<64x8xf32>
    %cst_14 = arith.constant dense<0.000000e+00> : vector<8xf32>
    %23 = vector.multi_reduction <add>, %22, %cst_14 [0] : vector<64x8xf32> to vector<8xf32>
    %24 = vector.shape_cast %23 : vector<8xf32> to vector<1x8xf32>
    %c0_15 = arith.constant 0 : index
    %c0_16 = arith.constant 0 : index
    %25 = vector.load %arg7[%c0_15, %c0_16] : memref<1x1xf32, #tpu.memory_space<vmem>>, vector<1x1xf32>
    %26 = vector.broadcast %25 : vector<1x1xf32> to vector<1x8xf32>
    %27 = arith.addf %24, %26 : vector<1x8xf32>
    %c0_17 = arith.constant 0 : index
    %c0_18 = arith.constant 0 : index
    %28 = vector.load %arg8[%c0_17, %c0_18] : memref<1x8xf32, #tpu.memory_space<vmem>>, vector<1x8xf32>
    tpu.vector_store %arg8[%c0_17, %c0_18], %27 {strides = array<i32>} : memref<1x8xf32, #tpu.memory_space<vmem>>, vector<1x8xf32>,
    return
  }
  func.func @transform_0(%arg0: i32) -> (i32, i32) {
    %c0_i32 = arith.constant 0 : i32
    %c0_i32_0 = arith.constant 0 : i32
    return %arg0, %c0_i32 : i32, i32
  }
  func.func @transform_1(%arg0: i32) -> (i32, i32) {
    %c0_i32 = arith.constant 0 : i32
    %c0_i32_0 = arith.constant 0 : i32
    %c0_i32_1 = arith.constant 0 : i32
    return %c0_i32, %c0_i32_0 : i32, i32
  }
  func.func @transform_2(%arg0: i32) -> (i32, i32) {
    %c0_i32 = arith.constant 0 : i32
    %c0_i32_0 = arith.constant 0 : i32
    %c0_i32_1 = arith.constant 0 : i32
    return %c0_i32, %c0_i32_0 : i32, i32
  }
  func.func @transform_3(%arg0: i32) -> (i32, i32) {
    %c0_i32 = arith.constant 0 : i32
    %c0_i32_0 = arith.constant 0 : i32
    %c0_i32_1 = arith.constant 0 : i32
    return %c0_i32, %c0_i32_0 : i32, i32
  }
  func.func @transform_4(%arg0: i32) -> (i32, i32) {
    %c0_i32 = arith.constant 0 : i32
    %c0_i32_0 = arith.constant 0 : i32
    %c0_i32_1 = arith.constant 0 : i32
    return %c0_i32, %c0_i32_0 : i32, i32
  }
  func.func @transform_5(%arg0: i32) -> (i32, i32) {
    %c0_i32 = arith.constant 0 : i32
    %c0_i32_0 = arith.constant 0 : i32
    %c0_i32_1 = arith.constant 0 : i32
    return %c0_i32, %c0_i32_0 : i32, i32
  }
  func.func @transform_6(%arg0: i32) -> (i32, i32) {
    %c0_i32 = arith.constant 0 : i32
    %c0_i32_0 = arith.constant 0 : i32
    %c0_i32_1 = arith.constant 0 : i32
    return %c0_i32, %c0_i32_0 : i32, i32
  }
  func.func @transform_7(%arg0: i32) -> (i32, i32) {
    %c0_i32 = arith.constant 0 : i32
    %c0_i32_0 = arith.constant 0 : i32
    return %arg0, %c0_i32 : i32, i32
  }
}

</mosaic_0001>

<bundles_post_ra>
// kernel: tpu_custom_call.1
= control target key start
LH: loop header
LB: loop body
LE: loop exit
PB: predicated region body
PF: predicated region fallthrough
CT: control target
= control target key end

     0   :  { %s495_s0 = inlined_call_operand.vmem [shape: f32[8,32], index: 0, kind: input, shape index: {}]   ;;  %s496_s1 = inlined_call_operand.vmem [shape: bf16[32,128], index: 1, kind: input, shape index: {}]   ;;  %s497_s2 = inlined_call_operand.vmem [shape: f32[1,128], index: 2, kind: input, shape index: {}]   ;;  %s498_s3 = inlined_call_operand.vmem [shape: bf16[128,64], index: 3, kind: input, shape index: {}]   ;;  %s499_s4 = inlined_call_operand.vmem [shape: f32[1,64], index: 4, kind: input, shape index: {}]   ;;  %s500_s5 = inlined_call_operand.vmem [shape: f32[64,1], index: 5, kind: input, shape index: {}]   ;;  %s501_s6 = inlined_call_operand.<no memory space> [shape: f32[1,1], index: 6, kind: input, shape index: {}]   ;;  %s502_s7 = inlined_call_operand.hbm [shape: f32[1,8], index: 7, kind: output, shape index: {}]  }
   0x1   :  { %v12_v0 = vstv %s501_s6 }
   0x2   :  { %13 = vst [vmem:[#allocation2] sm:$0x1] %v12_v0 }
   0x3   :  { %v333_v1 = vld [vmem:[%s496_s1 + $0x8] sm:$0xff]  ;;  %v341_v2 = vld [vmem:[%s498_s3 + $0x38] sm:$0xff]  ;;  %v332_v3 = vld [vmem:[%s496_s1] sm:$0xff] }
   0x4   :  { %62 = vmatpush.bf16.msra.mxu0 %v333_v1  ;;  %v30_v4 = vld [vmem:[%s495_s0] sm:$0xff]  ;;  %140 = vmatpush.bf16.msra.mxu1 %v341_v2  ;;  %v340_v5 = vld [vmem:[%s498_s3 + $0x30] sm:$0xff] }
   0x5   :  { %14 = vsyncpa [#allocation4], 0  ;;  %v31_v6 = vpack.c.bf16 %v30_v4, %v30_v4  ;;  %vm52_vm0 = vcmask 261120   ;;  %v339_v7 = vld [vmem:[%s498_s3 + $0x28] sm:$0xff]  ;;  %v338_v8 = vld [vmem:[%s498_s3 + $0x20] sm:$0xff]  ;;  %v376_v21 = vmov 0  }
   0x6   :  { %v337_v9 = vld [vmem:[%s498_s3 + $0x18] sm:$0xff]  ;;  %v336_v10 = vld [vmem:[%s498_s3 + $0x10] sm:$0xff]  ;;  %v335_v11 = vld [vmem:[%s498_s3 + $0x8] sm:$0xff]  ;;  %346 = vset.pattern.permute.xlu1 %v376_v21  ;;  %347 = vset.pattern.permute.xlu2 %v376_v21  ;;  %vm243_vm1 = vcmask 64512   ;;  %s282_s16 = sshll.u32 %s502_s7, 4  ;;  %vm273_vm2 = vcmask 57344   ;;  %s283_s16 = int_to_ptr.hbm [resolvable:$true] %s282_s16 }
   0x7   :  { %v334_v12 = vld [vmem:[%s498_s3] sm:$0xff]  ;;  %v188_v20 = vld [vmem:[%s500_s5 + $0x8] sm:$0xff]  ;;  %v190_v22 = vld [vmem:[%s500_s5 + $0x18] sm:$0xff] }
   0x8   :  { %63 = vmatpush.bf16.msra.mxu0 %v332_v3  ;;  %141 = vmatpush.bf16.msra.mxu1 %v340_v5  ;;  %v348_v13 = vld [vmem:[%s497_s2] ss:$0 sm:$0xff]  ;;  %v189_v23 = vld [vmem:[%s500_s5 + $0x10] sm:$0xff]  ;;  %v192_v25 = vld [vmem:[%s500_s5 + $0x28] sm:$0xff] }
   0x9   :  { %202 = vperm.xlu1 %346, %v188_v20   ;;  %212 = vperm.xlu2 %347, %v190_v22   ;;  %v191_v24 = vld [vmem:[%s500_s5 + $0x20] sm:$0xff]  ;;  %v194_v27 = vld [vmem:[%s500_s5 + $0x38] sm:$0xff]  ;;  %v193_v33 = vld [vmem:[%s500_s5 + $0x30] sm:$0xff] }
   0xa   :  { %v349_v26 = vld [vmem:[%s499_s4] ss:$0 sm:$0xff] }
   0xb   :  { %299 = vmatmul.msk.bf16.vlgmr.msra.gmra.mxu0 %vm52_vm0, %v31_v6  ;;  %v265_v34 = vld [vmem:[#allocation2] sm:$0x1] }
   0xc   :  { %142 = vmatpush.bf16.msra.mxu1 %v339_v7  ;;  %v187_v35 = vld [vmem:[%s500_s5] sm:$0xff]  ;;  %s377_s5 = smov [#allocation3]  }
   0xd   :  { %s280_s14 = sshll.u32 %s377_s5, 4  ;;  %s281_s14 = int_to_ptr.vmem [resolvable:$true] %s280_s14 }
  0x10   :  { %143 = vmatpush.bf16.msra.mxu1 %v338_v8 }
  0x11   :  { %207 = vperm.xlu1 %346, %v189_v23   ;;  %217 = vperm.xlu2 %347, %v191_v24  }
  0x14   :  { %144 = vmatpush.bf16.msra.mxu1 %v337_v9 }
  0x18   :  { %145 = vmatpush.bf16.msra.mxu1 %v336_v10 }
  0x19   :  { %222 = vperm.xlu1 %346, %v192_v25   ;;  %227 = vperm.xlu2 %347, %v193_v33  }
  0x1c   :  { %146 = vmatpush.bf16.msra.mxu1 %v335_v11 }
  0x20   :  { %147 = vmatpush.bf16.msra.mxu1 %v334_v12 }
  0x21   :  { %232 = vperm.xlu1 %346, %v194_v27   ;;  %268 = vperm.xlu2 %347, %v265_v34  }
  0x63   :  { %v213_v44 = vpop.permute.xlu2 %212 }
  0x6b   :  { %v218_v47 = vpop.permute.xlu2 %217 }
  0x73   :  { %v228_v59 = vpop.permute.xlu2 %227 }
  0x7b   :  { %v203_v42 = vpop.permute.xlu1 %202 }
  0x83   :  { %v208_v45 = vpop.permute.xlu1 %207 }
  0x88   :  { %v65_v14 = vpop.f32.mrf.mxu0 }
  0x89   :  { %v66_v15 = vadd.f32 %v348_v13, %v65_v14 }
  0x8b   :  { %v69_v16 = vmul.f32 0.2, %v66_v15  ;;  %v223_v49 = vpop.permute.xlu1 %222 }
  0x8d   :  { %v70_v17 = vmax.f32 %v66_v15, %v69_v16  ;;  %v269_v15 = vpop.permute.xlu2 %268 }
  0x8f   :  { %v71_v18 = vpack.c.bf16 %v70_v17, %v70_v17  ;;  %v271_v17 = vperm.slane %v269_v15, 0 }
  0x90   :  { %v67_v19 = vpop.f32.mrf.mxu0 }
  0x91   :  { %148 = vmatmul.bf16.vlgmr.msra.gmra.mxu1 %v71_v18 }
  0x93   :  { %v233_v63 = vpop.permute.xlu1 %232 }
 0x10e   :  { %v149_v28 = vpop.f32.mrf.mxu1 }
 0x10f   :  { %v150_v29 = vadd.f32 %v349_v26, %v149_v28 }
 0x111   :  { %v153_v30 = vmul.f32 0.2, %v150_v29 }
 0x113   :  { %v154_v31 = vmax.f32 %v150_v29, %v153_v30 }
 0x115   :  { %155 = vxpose.xlu0.b32.start.end [1/1] (short) (narrow) %v154_v31, 64 }
 0x116   :  { %v151_v32 = vpop.f32.mrf.mxu1 }
 0x17c   :  { %345 = vset.pattern.permute.xlu0 %v376_v21 }
 0x1b9   :  { %v171_v36 = vpop.trf.xlu0 }
 0x1bb   :  { %197 = vperm.xlu0 %345, %v187_v35  }
 0x1c1   :  { %v172_v37 = vpop.trf.xlu0 }
 0x1c2   :  { %v236_v48 = vmul.f32 %v203_v42, %v172_v37 }
 0x1c4   :  { %v245_v53 = vsel %vm243_vm1, %v236_v48, 0.0 }
 0x1c9   :  { %v173_v38 = vpop.trf.xlu0 }
 0x1ca   :  { %v237_v51 = vmul.f32 %v208_v45, %v173_v38 }
 0x1cc   :  { %v247_v57 = vsel %vm243_vm1, %v237_v51, 0.0 }
 0x1d1   :  { %v174_v39 = vpop.trf.xlu0 }
 0x1d2   :  { %v238_v54 = vmul.f32 %v213_v44, %v174_v39 }
 0x1d4   :  { %v249_v61 = vsel %vm243_vm1, %v238_v54, 0.0 }
 0x1d9   :  { %v175_v40 = vpop.trf.xlu0 }
 0x1da   :  { %v239_v58 = vmul.f32 %v218_v47, %v175_v40 }
 0x1dc   :  { %v251_v1 = vsel %vm243_vm1, %v239_v58, 0.0 }
 0x1e1   :  { %v176_v41 = vpop.trf.xlu0 }
 0x1e2   :  { %v240_v62 = vmul.f32 %v223_v49, %v176_v41 }
 0x1e4   :  { %v253_v4 = vsel %vm243_vm1, %v240_v62, 0.0 }
 0x1e9   :  { %v177_v43 = vpop.trf.xlu0 }
 0x1ea   :  { %v241_v2 = vmul.f32 %v228_v59, %v177_v43 }
 0x1ec   :  { %v255_v7 = vsel %vm243_vm1, %v241_v2, 0.0 }
 0x1f1   :  { %v178_v46 = vpop.trf.xlu0 }
 0x1f2   :  { %v242_v5 = vmul.f32 %v233_v63, %v178_v46 }
 0x1f4   :  { %v257_v9 = vsel %vm243_vm1, %v242_v5, 0.0 }
 0x22d   :  { %v198_v50 = vpop.permute.xlu0 %197 }
 0x22e   :  { %v235_v52 = vmul.f32 %v198_v50, %v171_v36 }
 0x230   :  { %v244_v55 = vsel %vm243_vm1, %v235_v52, 0.0 }
 0x231   :  { %v246_v56 = vadd.f32 %v245_v53, %v244_v55 }
 0x233   :  { %v248_v60 = vadd.f32 %v247_v57, %v246_v56 }
 0x235   :  { %v250_v0 = vadd.f32 %v249_v61, %v248_v60 }
 0x237   :  { %v252_v3 = vadd.f32 %v251_v1, %v250_v0 }
 0x239   :  { %v254_v6 = vadd.f32 %v253_v4, %v252_v3 }
 0x23b   :  { %v256_v8 = vadd.f32 %v255_v7, %v254_v6 }
 0x23d   :  { %v258_v10 = vadd.f32 %v257_v9, %v256_v8 }
 0x23f   :  { %v259_v11 = vrot.slane %v258_v10, 4 }
 0x241   :  { %v260_v12 = vadd.f32 %v259_v11, %v258_v10 }
 0x243   :  { %v261_v13 = vrot.slane %v260_v12, 2 }
 0x245   :  { %v262_v14 = vadd.f32 %v261_v13, %v260_v12 }
 0x247   :  { %v263_v16 = vrot.slane %v262_v14, 1 }
 0x249   :  { %v264_v18 = vadd.f32 %v263_v16, %v262_v14 }
 0x24b   :  { %v272_v19 = vadd.f32 %v271_v17, %v264_v18 }
 0x24d   :  { %274 = vst.msk [vmem:[#allocation3] sm:$0x1] %vm273_vm2, %v272_v19 }
 0x24e   :  { %285 = dma.vmem_to_hbm [thread:$0]  %s281_s14, 16, %s283_s16, [#allocation4]  }
 0x24f   :  { %374 = dma.done.wait [#allocation4], 16  }
 0x250   :  { %375 = vsyncadd [#allocation4], 4294967280 }
 0x251   :  { %290 = vsyncpa [#allocation4], 1 }

</bundles_post_ra>
